<compile_context>
chip_gen: v6e
topology: v6e:2x2x1
jax: 0.10.0
libtpu: 0.0.40
codegen_flags: <defaults>
</compile_context>

<pallas_src>
import functools

import jax
import jax.numpy as jnp
from jax.experimental import pallas as pl
from jax.experimental.pallas import tpu as pltpu

_LANES = 128
_ROW_ALIGN = 32          # int8 output min tile is (32, 128)
_MAX_BLOCK_ROWS = 2048   # 2048*128 edges per block


def _round_up(x, m):
    return (x + m - 1) // m * m


def _hash_u32(x, seed_mixed):
    """xorshift-multiply finalizer: a single 32-bit multiply per hash."""
    x = x ^ seed_mixed
    x = x ^ (x >> jnp.uint32(16))
    x = x * jnp.uint32(0x7FEB352D)
    x = x ^ (x >> jnp.uint32(15))
    return x


def _drop_node_kernel(seed_ref, ei_ref, mask_ref, *, threshold):
    """Per-edge keep mask (int8), computed elementwise on the VPU.

    seed_ref: SMEM scalar-prefetch (1,) int32
    ei_ref:   (2, block_rows, 128) int32 tile (plane 0 = src, plane 1 = dst)
    mask_ref: (block_rows, 128) int8 output tile (1 = keep edge)
    """
    seed_mixed = seed_ref[0].astype(jnp.uint32) * jnp.uint32(0x9E3779B9)
    thr = jnp.uint32(threshold)
    keep_src = _hash_u32(ei_ref[0].astype(jnp.uint32), seed_mixed) < thr
    keep_dst = _hash_u32(ei_ref[1].astype(jnp.uint32), seed_mixed) < thr
    mask_ref[...] = (keep_src & keep_dst).astype(jnp.int8)


@functools.partial(jax.jit, static_argnames=("threshold",))
def _drop_node_padded(edge_index, edge_weight, seed_arr, *, threshold):
    """Jittable core.

    Returns (kept edge_index padded to E columns, kept weights padded to E,
    number of kept edges).  Everything stays on device; no host sync.
    """
    E = edge_index.shape[1]

    # Row layout: edges as (rows, 128), rows a multiple of 32 (int8 tiling).
    rows = _round_up(max(-(-E // _LANES), 1), _ROW_ALIGN)
    num_blocks = -(-rows // _MAX_BLOCK_ROWS)
    if num_blocks == 1 and rows >= 2 * _ROW_ALIGN:
        num_blocks = 2                       # v7x: feed both TensorCores
    block_rows = _round_up(-(-rows // num_blocks), _ROW_ALIGN)
    rows = block_rows * num_blocks           # <= 31 padding rows per block
    e_pad = rows * _LANES

    # Single contiguous input: one pad on the lane axis, fill value irrelevant
    # because padded slots sit at flat positions >= E and are sliced off below.
    ei_tiles = jnp.pad(edge_index, ((0, 0), (0, e_pad - E))).reshape(
        2, rows, _LANES)

    kernel = functools.partial(_drop_node_kernel, threshold=threshold)
    mask2d = pl.pallas_call(
        kernel,
        out_shape=jax.ShapeDtypeStruct((rows, _LANES), jnp.int8),
        grid_spec=pltpu.PrefetchScalarGridSpec(
            num_scalar_prefetch=1,
            grid=(num_blocks,),
            in_specs=[pl.BlockSpec((2, block_rows, _LANES),
                                   lambda i, seed: (0, i, 0))],
            out_specs=pl.BlockSpec((block_rows, _LANES),
                                   lambda i, seed: (i, 0)),
        ),
        compiler_params=pltpu.CompilerParams(
            dimension_semantics=("parallel",)),
    )(seed_arr, ei_tiles)

    keep = mask2d.reshape(-1)[:E] > 0        # padding tail never read
    num_kept = jnp.sum(keep.astype(jnp.int32))

    # Fixed-capacity compaction (jittable, no host sync).
    keep_idx = jnp.nonzero(keep, size=E, fill_value=0)[0]
    out_ei = jnp.take(edge_index, keep_idx, axis=1)
    out_ew = (jnp.take(edge_weight, keep_idx)
              if edge_weight is not None else None)
    return out_ei, out_ew, num_kept


def drop_node_pallas(edge_index, edge_weight=None, p=0.5, training=True, seed=0):
    """JAX/Pallas equivalent of graphwar's DropNode.forward.

    edge_index: (2, E) int array;  edge_weight: optional (E,) float array.
    Returns (edge_index_kept, edge_weight_kept): edges whose both endpoints
    survived a per-node Bernoulli(1 - p) draw; weights carried unchanged.
    Vary `seed` per training step to get fresh draws.
    """
    if p < 0.0 or p > 1.0:
        raise ValueError(f"Dropout probability has to be between 0 and 1, got {p}")

    edge_index = jnp.asarray(edge_index, jnp.int32)
    has_weight = edge_weight is not None
    if has_weight:
        edge_weight = jnp.asarray(edge_weight)
    E = int(edge_index.shape[1])

    if (not training) or p == 0.0 or E == 0:
        return edge_index, (edge_weight if has_weight else None)

    keep_prob = 1.0 - float(p)
    threshold = min(int(keep_prob * (1 << 32)), (1 << 32) - 1)
    seed_arr = jnp.asarray([seed], jnp.int32)

    out_ei, out_ew, num_kept = _drop_node_padded(
        edge_index, edge_weight if has_weight else None, seed_arr,
        threshold=threshold)

    # TODO(synk): PyTorch returns dynamically-shaped tensors; the single host
    # sync below (int(num_kept)) exists only for that final slice -- use
    # _drop_node_padded directly to stay fully on-device / inside jit.
    n = int(num_kept)
    return out_ei[:, :n], (out_ew[:n] if has_weight else None)


def _reference_drop(edge_index, edge_weight, p, seed):
    """Pure-JAX reference with the same per-node hash (checks all plumbing)."""
    thr = jnp.uint32(min(int((1.0 - p) * (1 << 32)), (1 << 32) - 1))
    seed_mixed = jnp.uint32(seed) * jnp.uint32(0x9E3779B9)
    keep_src = _hash_u32(edge_index[0].astype(jnp.uint32), seed_mixed) < thr
    keep_dst = _hash_u32(edge_index[1].astype(jnp.uint32), seed_mixed) < thr
    idx = jnp.nonzero(keep_src & keep_dst)[0]
    ref_ei = jnp.take(edge_index, idx, axis=1)
    ref_ew = jnp.take(edge_weight, idx) if edge_weight is not None else None
    return ref_ei, ref_ew


if __name__ == "__main__":
    key = jax.random.PRNGKey(0)
    k1, k2, k3, k4 = jax.random.split(key, 4)
    p, seed = 0.5, 0

    # --- small case ---
    num_nodes, num_edges = 16, 32
    edge_index = jax.random.randint(k1, (2, num_edges), 0, num_nodes,
                                    dtype=jnp.int32)
    edge_weight = jax.random.uniform(k2, (num_edges,), dtype=jnp.float32)

    out_ei, out_ew = drop_node_pallas(edge_index, edge_weight, p=p,
                                      training=True, seed=seed)
    jax.block_until_ready(out_ei)
    if out_ew is not None:
        jax.block_until_ready(out_ew)

    assert out_ei.shape[0] == 2 and out_ei.shape[1] <= num_edges
    assert out_ew.shape[0] == out_ei.shape[1]
    ref_ei, ref_ew = _reference_drop(edge_index, edge_weight, p, seed)
    assert jnp.array_equal(out_ei, ref_ei)
    assert jnp.array_equal(out_ew, ref_ew)

    # --- larger case: exercises the multi-block ("parallel") grid path ---
    num_nodes2, num_edges2 = 500, 5000
    edge_index2 = jax.random.randint(k3, (2, num_edges2), 0, num_nodes2,
                                     dtype=jnp.int32)
    edge_weight2 = jax.random.uniform(k4, (num_edges2,), dtype=jnp.float32)
    out_ei2, out_ew2 = drop_node_pallas(edge_index2, edge_weight2, p=p,
                                        training=True, seed=7)
    jax.block_until_ready(out_ei2)
    ref_ei2, ref_ew2 = _reference_drop(edge_index2, edge_weight2, p, 7)
    assert jnp.array_equal(out_ei2, ref_ei2)
    assert jnp.array_equal(out_ew2, ref_ew2)

    # --- eval / p=0 passthrough and p=1 drop-everything ---
    ei_eval, ew_eval = drop_node_pallas(edge_index, edge_weight, p=p,
                                        training=False)
    assert jnp.array_equal(ei_eval, edge_index)
    assert jnp.array_equal(ew_eval, edge_weight)
    ei_all, ew_all = drop_node_pallas(edge_index, edge_weight, p=1.0,
                                      training=True, seed=seed)
    assert ei_all.shape == (2, 0) and ew_all.shape == (0,)

    print("KERNEL_OK")
</pallas_src>

<mosaic_0001>
module attributes {stable_mosaic.version = 11 : i64} {
  func.func private @main(%arg0: i32) attributes {dimension_semantics = [#tpu.dimension_semantics<core_parallel>], iteration_bounds = array<i64: 2>, tpu.core_type = #tpu.core_type<sc_scalar_subcore>, window_params = []} {
    return
  }
}

module attributes {stable_mosaic.version = 11 : i64} {
  func.func private @main(%arg0: i32) attributes {dimension_semantics = [#tpu.dimension_semantics<core_parallel>], iteration_bounds = array<i64: 2>, tpu.core_type = #tpu.core_type<sc_scalar_subcore>, window_params = []} {
    return
  }
}

module attributes {stable_mosaic.version = 11 : i64} {
  func.func @_drop_node_kernel(%arg0: i32, %arg1: memref<1xi32, #tpu.memory_space<smem>>, %arg2: memref<2x32x128xi32, #tpu.memory_space<vmem>>, %arg3: memref<32x128xi8, #tpu.memory_space<vmem>>) attributes {dimension_semantics = [#tpu.dimension_semantics<parallel>], iteration_bounds = array<i64: 1>, scalar_prefetch = 1 : i64, scratch_operands = 0 : i64, tpu.core_type = #tpu.core_type<tc>, window_params = [{transform_indices = @transform_0, window_bounds = array<i64: 2, 32, 128>}, {transform_indices = @transform_1, window_bounds = array<i64: 32, 128>}]} {
    %c0 = arith.constant 0 : index
    %0 = memref.load %arg1[%c0] : memref<1xi32, #tpu.memory_space<smem>>
    %c-1640531527_i32 = arith.constant -1640531527 : i32
    %1 = arith.muli %0, %c-1640531527_i32 : i32
    %c0_0 = arith.constant 0 : index
    %c0_1 = arith.constant 0 : index
    %c0_2 = arith.constant 0 : index
    %2 = vector.load %arg2[%c0_0, %c0_1, %c0_2] : memref<2x32x128xi32, #tpu.memory_space<vmem>>, vector<1x32x128xi32>
    %3 = vector.shape_cast %2 : vector<1x32x128xi32> to vector<32x128xi32>
    %4 = vector.broadcast %1 : i32 to vector<32x128xi32>
    %5 = arith.xori %3, %4 : vector<32x128xi32>
    %c16_i32 = arith.constant 16 : i32
    %6 = vector.broadcast %c16_i32 : i32 to vector<32x128xi32>
    %7 = arith.shrui %5, %6 : vector<32x128xi32>
    %8 = arith.xori %5, %7 : vector<32x128xi32>
    %c2146121005_i32 = arith.constant 2146121005 : i32
    %9 = vector.broadcast %c2146121005_i32 : i32 to vector<32x128xi32>
    %10 = arith.muli %8, %9 : vector<32x128xi32>
    %c15_i32 = arith.constant 15 : i32
    %11 = vector.broadcast %c15_i32 : i32 to vector<32x128xi32>
    %12 = arith.shrui %10, %11 : vector<32x128xi32>
    %13 = arith.xori %10, %12 : vector<32x128xi32>
    %c-2147483648_i32 = arith.constant -2147483648 : i32
    %14 = vector.broadcast %c-2147483648_i32 : i32 to vector<32x128xi32>
    %15 = arith.cmpi ult, %13, %14 : vector<32x128xi32>
    %c1 = arith.constant 1 : index
    %c0_3 = arith.constant 0 : index
    %c0_4 = arith.constant 0 : index
    %16 = vector.load %arg2[%c1, %c0_3, %c0_4] : memref<2x32x128xi32, #tpu.memory_space<vmem>>, vector<1x32x128xi32>
    %17 = vector.shape_cast %16 : vector<1x32x128xi32> to vector<32x128xi32>
    %18 = vector.broadcast %1 : i32 to vector<32x128xi32>
    %19 = arith.xori %17, %18 : vector<32x128xi32>
    %c16_i32_5 = arith.constant 16 : i32
    %20 = vector.broadcast %c16_i32_5 : i32 to vector<32x128xi32>
    %21 = arith.shrui %19, %20 : vector<32x128xi32>
    %22 = arith.xori %19, %21 : vector<32x128xi32>
    %c2146121005_i32_6 = arith.constant 2146121005 : i32
    %23 = vector.broadcast %c2146121005_i32_6 : i32 to vector<32x128xi32>
    %24 = arith.muli %22, %23 : vector<32x128xi32>
    %c15_i32_7 = arith.constant 15 : i32
    %25 = vector.broadcast %c15_i32_7 : i32 to vector<32x128xi32>
    %26 = arith.shrui %24, %25 : vector<32x128xi32>
    %27 = arith.xori %24, %26 : vector<32x128xi32>
    %c-2147483648_i32_8 = arith.constant -2147483648 : i32
    %28 = vector.broadcast %c-2147483648_i32_8 : i32 to vector<32x128xi32>
    %29 = arith.cmpi ult, %27, %28 : vector<32x128xi32>
    %30 = arith.andi %15, %29 : vector<32x128xi1>
    %31 = arith.extui %30 : vector<32x128xi1> to vector<32x128xi8>
    %c0_9 = arith.constant 0 : index
    %c0_10 = arith.constant 0 : index
    %32 = vector.load %arg3[%c0_9, %c0_10] : memref<32x128xi8, #tpu.memory_space<vmem>>, vector<32x128xi8>
    tpu.vector_store %arg3[%c0_9, %c0_10], %31 {strides = array<i32>} : memref<32x128xi8, #tpu.memory_space<vmem>>, vector<32x128xi8>,
    return
  }
  func.func @transform_0(%arg0: i32, %arg1: memref<1xi32, #tpu.memory_space<smem>>) -> (i32, i32, i32) {
    %c0_i32 = arith.constant 0 : i32
    %c0_i32_0 = arith.constant 0 : i32
    %c0_i32_1 = arith.constant 0 : i32
    return %c0_i32, %arg0, %c0_i32_0 : i32, i32, i32
  }
  func.func @transform_1(%arg0: i32, %arg1: memref<1xi32, #tpu.memory_space<smem>>) -> (i32, i32) {
    %c0_i32 = arith.constant 0 : i32
    %c0_i32_0 = arith.constant 0 : i32
    return %arg0, %c0_i32 : i32, i32
  }
}

</mosaic_0001>

<bundles_post_ra>
// kernel: _drop_node_padded.1
= control target key start
LH: loop header
LB: loop body
LE: loop exit
PB: predicated region body
PF: predicated region fallthrough
CT: control target
= control target key end

     0   :  { %v113_v57 = vmov 0   ;;  %s168_s0 = inlined_call_operand.<no memory space> [shape: s32[1], index: 0, kind: input, shape index: {}]   ;;  %s169_s1 = inlined_call_operand.vmem [shape: s32[2,32,128], index: 1, kind: input, shape index: {}]   ;;  %s170_s2 = inlined_call_operand.vmem [shape: s8[32,128], index: 2, kind: output, shape index: {}]  }
   0x1   :  { %s13_s11 = smul.u32 2654435769, %s168_s0  ;;  %v14_v0 = vld [vmem:[%s169_s1] sm:$0xff]  ;;  %v15_v1 = vld [vmem:[%s169_s1 + $0x8] sm:$0xff]  ;;  %v16_v2 = vld [vmem:[%s169_s1 + $0x10] sm:$0xff] }
   0x2   :  { %v17_v3 = vld [vmem:[%s169_s1 + $0x18] sm:$0xff]  ;;  %v108_v4 = vld [vmem:[%s169_s1 + $0x20] sm:$0xff]  ;;  %v109_v5 = vld [vmem:[%s169_s1 + $0x28] sm:$0xff] }
   0x3   :  { %v18_v6 = vstv %s13_s11  ;;  %v110_v7 = vld [vmem:[%s169_s1 + $0x30] sm:$0xff]  ;;  %v111_v8 = vld [vmem:[%s169_s1 + $0x38] sm:$0xff] }
   0x4   :  { %v19_v9 = vxor.u32 %v18_v6, %v14_v0  ;;  %v20_v10 = vxor.u32 %v18_v6, %v15_v1  ;;  %v21_v11 = vxor.u32 %v18_v6, %v16_v2  ;;  %v22_v12 = vxor.u32 %v18_v6, %v17_v3 }
   0x5   :  { %v52_v13 = vxor.u32 %v108_v4, %v18_v6  ;;  %v53_v14 = vxor.u32 %v109_v5, %v18_v6  ;;  %v54_v15 = vxor.u32 %v110_v7, %v18_v6  ;;  %v55_v16 = vxor.u32 %v111_v8, %v18_v6 }
   0x6   :  { %v23_v17 = vshrl.u32 %v19_v9, 16  ;;  %v24_v18 = vshrl.u32 %v20_v10, 16  ;;  %v25_v19 = vshrl.u32 %v21_v11, 16  ;;  %v26_v20 = vshrl.u32 %v22_v12, 16 }
   0x7   :  { %v56_v21 = vshrl.u32 %v52_v13, 16  ;;  %v57_v22 = vshrl.u32 %v53_v14, 16  ;;  %v58_v23 = vshrl.u32 %v54_v15, 16  ;;  %v59_v24 = vshrl.u32 %v55_v16, 16 }
   0x8   :  { %v27_v25 = vxor.u32 %v23_v17, %v19_v9  ;;  %v28_v26 = vxor.u32 %v24_v18, %v20_v10  ;;  %v29_v27 = vxor.u32 %v25_v19, %v21_v11  ;;  %v30_v28 = vxor.u32 %v26_v20, %v22_v12 }
   0x9   :  { %v60_v29 = vxor.u32 %v56_v21, %v52_v13  ;;  %v61_v30 = vxor.u32 %v57_v22, %v53_v14  ;;  %v62_v31 = vxor.u32 %v58_v23, %v54_v15  ;;  %v63_v32 = vxor.u32 %v59_v24, %v55_v16 }
   0xa   :  { %v31_v33 = vmul.u32 2146121005, %v27_v25  ;;  %v32_v34 = vmul.u32 2146121005, %v28_v26 }
   0xb   :  { %v33_v35 = vmul.u32 2146121005, %v29_v27  ;;  %v34_v36 = vmul.u32 2146121005, %v30_v28 }
   0xc   :  { %v35_v37 = vshrl.u32 %v31_v33, 15  ;;  %v36_v38 = vshrl.u32 %v32_v34, 15  ;;  %v64_v39 = vmul.u32 2146121005, %v60_v29  ;;  %v65_v40 = vmul.u32 2146121005, %v61_v30 }
   0xd   :  { %v37_v41 = vshrl.u32 %v33_v35, 15  ;;  %v38_v42 = vshrl.u32 %v34_v36, 15  ;;  %v66_v43 = vmul.u32 2146121005, %v62_v31  ;;  %v67_v44 = vmul.u32 2146121005, %v63_v32 }
   0xe   :  { %v39_v45 = vxor.u32 %v35_v37, %v31_v33  ;;  %v40_v46 = vxor.u32 %v36_v38, %v32_v34  ;;  %v68_v47 = vshrl.u32 %v64_v39, 15  ;;  %v69_v48 = vshrl.u32 %v65_v40, 15 }
   0xf   :  { %v41_v49 = vxor.u32 %v37_v41, %v33_v35  ;;  %v42_v50 = vxor.u32 %v38_v42, %v34_v36  ;;  %v70_v51 = vshrl.u32 %v66_v43, 15  ;;  %v71_v52 = vshrl.u32 %v67_v44, 15 }
  0x10   :  { %vm43_vm0 = vcmp.lt.u32.totalorder %v39_v45, 2147483648  ;;  %v72_v53 = vxor.u32 %v68_v47, %v64_v39  ;;  %v73_v54 = vxor.u32 %v69_v48, %v65_v40  ;;  %vm44_vm1 = vcmp.lt.u32.totalorder %v40_v46, 2147483648 }
  0x11   :  { %v74_v55 = vxor.u32 %v70_v51, %v66_v43  ;;  %v75_v56 = vxor.u32 %v71_v52, %v67_v44  ;;  %vm45_vm2 = vcmp.lt.u32.totalorder %v41_v49, 2147483648  ;;  %vm46_vm5 = vcmp.lt.u32.totalorder %v42_v50, 2147483648 }
  0x12   :  { %vm76_vm3 = vcmp.lt.u32.totalorder %v72_v53, 2147483648  ;;  %vm77_vm4 = vcmp.lt.u32.totalorder %v73_v54, 2147483648 }
  0x13   :  { %vm78_vm6 = vcmp.lt.u32.totalorder %v74_v55, 2147483648  ;;  %vm79_vm7 = vcmp.lt.u32.totalorder %v75_v56, 2147483648  ;;  %vm80_vm8 = vmand %vm43_vm0, %vm76_vm3 }
  0x14   :  { %vm81_vm9 = vmand %vm44_vm1, %vm77_vm4 }
  0x15   :  { %vm82_vm10 = vmand %vm45_vm2, %vm78_vm6 }
  0x16   :  { %vm83_vm11 = vmand %vm46_vm5, %vm79_vm7 }
  0x17   :  { %vm84_vm12 = vmpackc.low %vm81_vm9, %vm80_vm8 }
  0x18   :  { %vm85_vm13 = vmpackc.low %vm83_vm11, %vm82_vm10 }
  0x19   :  { %vm86_vm14 = vmpackc.even %vm85_vm13, %vm84_vm12 }
  0x1a   :  { %v87_v58 = vsel %vm86_vm14, 16843009, %v113_v57 }
  0x1b   :  { %v88_v59 = vunpack.c.0.s8 %v87_v58  ;;  %v89_v60 = vunpack.c.1.s8 %v87_v58  ;;  %v90_v61 = vunpack.c.2.s8 %v87_v58  ;;  %v91_v62 = vunpack.c.3.s8 %v87_v58 }
  0x1d   :  { %v92_v63 = vpack.c.b16 %v88_v59, %v88_v59  ;;  %v94_v0 = vpack.c.b16 %v89_v60, %v89_v60  ;;  %v96_v1 = vpack.c.b16 %v90_v61, %v90_v61  ;;  %v98_v2 = vpack.c.b16 %v91_v62, %v91_v62 }
  0x1f   :  { %v93_v3 = vpack.c.b8 %v92_v63, %v92_v63  ;;  %v95_v4 = vpack.c.b8 %v94_v0, %v94_v0  ;;  %v97_v5 = vpack.c.b8 %v96_v1, %v96_v1  ;;  %v99_v6 = vpack.c.b8 %v98_v2, %v98_v2 }
  0x21   :  { %100 = vst [vmem:[%s170_s2] sm:$0x3] %v93_v3  ;;  %101 = vst [vmem:[%s170_s2 + $0x2] sm:$0x3] %v95_v4 }
  0x22   :  { %102 = vst [vmem:[%s170_s2 + $0x4] sm:$0x3] %v97_v5  ;;  %103 = vst [vmem:[%s170_s2 + $0x6] sm:$0x3] %v99_v6 }

</bundles_post_ra>
